<compile_context>
chip_gen: v5e
topology: v5e:2x2
jax: 0.10.0
libtpu: 0.0.40
codegen_flags: <defaults>
</compile_context>

<pallas_src>
import functools

import jax
import jax.numpy as jnp
from jax.experimental import pallas as pl
from jax.experimental.pallas import tpu as pltpu

GAMMA = 1.5
ALPHA = 0.25
LANES = 128
SUBLANES = 8
MAX_BLOCK_ROWS = 2048   # 2048*128*4B = 1 MiB/input/buffer -> 4 MiB double-buffered
NCORES = 2              # parallel grid slices (v7x has 2 TCs; harmless elsewhere)


def _round_up(x, m):
    return ((x + m - 1) // m) * m


def _focal_loss_kernel(pred_ref, true_ref, out_ref, acc_ref, *, gamma, alpha,
                       block_rows, steps_per_core, total_elems, needs_mask):
    c = pl.program_id(0)   # parallel slice
    k = pl.program_id(1)   # reduction step within the slice

    @pl.when(k == 0)
    def _():
        acc_ref[...] = jnp.zeros_like(acc_ref)

    x = pred_ref[...].astype(jnp.float32)
    y = true_ref[...].astype(jnp.float32)

    # Shared transcendental: e = exp(-|x|) feeds both the stable BCE softplus
    # term and the sigmoid, so only one exp / one log1p / one recip per elem.
    e = jnp.exp(-jnp.abs(x))
    inv = 1.0 / (1.0 + e)                         # sigmoid(|x|)
    # BCEWithLogits (stable): max(x,0) - x*y + log1p(exp(-|x|))
    bce = jnp.maximum(x, 0.0) - x * y + jnp.log1p(e)
    pred_prob = jnp.where(x >= 0.0, inv, e * inv)  # sigmoid(x)

    p_t = y * pred_prob + (1.0 - y) * (1.0 - pred_prob)
    alpha_factor = y * alpha + (1.0 - y) * (1.0 - alpha)
    one_minus_pt = 1.0 - p_t
    if float(gamma) == 1.5:
        # x**1.5 = x * sqrt(x): avoids exp(gamma*log(x)) and the log(0) inf.
        modulating_factor = one_minus_pt * jnp.sqrt(one_minus_pt)
    else:
        modulating_factor = one_minus_pt ** gamma

    loss = bce * alpha_factor * modulating_factor

    if needs_mask:
        # Zero out the padded tail so the reduction only sees real elements.
        block_idx = c * steps_per_core + k
        row = jax.lax.broadcasted_iota(jnp.int32, loss.shape, 0)
        lane = jax.lax.broadcasted_iota(jnp.int32, loss.shape, 1)
        gidx = (block_idx * block_rows + row) * LANES + lane
        loss = jnp.where(gidx < total_elems, loss, 0.0)

    # VPU-only partial accumulation into a vreg-shaped (8,128) accumulator:
    # reshape groups sublane-tiles contiguously, sum over the leading axis.
    acc_ref[...] += jnp.sum(
        loss.reshape(block_rows // SUBLANES, SUBLANES, LANES), axis=0)

    @pl.when(k == pl.num_programs(1) - 1)
    def _():
        out_ref[...] = acc_ref[...]


def focal_loss(pred, true, *, gamma=GAMMA, alpha=ALPHA, reduction="mean"):
    """Focal loss over BCE-with-logits; pred/true are any shape (same)."""
    assert pred.shape == true.shape
    if reduction not in ("mean", "sum"):
        # TODO(synk): reduction='none' (elementwise output) not implemented.
        raise NotImplementedError("focal_loss kernel supports 'mean'/'sum'")

    total = pred.size
    rows = pl.cdiv(total, LANES)
    block_rows = min(MAX_BLOCK_ROWS, _round_up(rows, SUBLANES))
    rows_padded = _round_up(rows, NCORES * block_rows)
    steps_per_core = rows_padded // (NCORES * block_rows)
    padded_total = rows_padded * LANES
    needs_mask = padded_total != total

    p_flat = pred.reshape(-1)
    t_flat = true.reshape(-1)
    if needs_mask:
        pad = padded_total - total
        p_flat = jnp.pad(p_flat, (0, pad))
        t_flat = jnp.pad(t_flat, (0, pad))
    p2d = p_flat.reshape(rows_padded, LANES)
    t2d = t_flat.reshape(rows_padded, LANES)

    kernel = functools.partial(
        _focal_loss_kernel,
        gamma=gamma,
        alpha=alpha,
        block_rows=block_rows,
        steps_per_core=steps_per_core,
        total_elems=total,
        needs_mask=needs_mask,
    )

    in_map = lambda c, k: (c * steps_per_core + k, 0)
    partials = pl.pallas_call(
        kernel,
        out_shape=jax.ShapeDtypeStruct((NCORES * SUBLANES, LANES), jnp.float32),
        grid_spec=pltpu.PrefetchScalarGridSpec(
            num_scalar_prefetch=0,
            grid=(NCORES, steps_per_core),
            in_specs=[
                pl.BlockSpec((block_rows, LANES), in_map),
                pl.BlockSpec((block_rows, LANES), in_map),
            ],
            out_specs=pl.BlockSpec((SUBLANES, LANES), lambda c, k: (c, 0)),
            scratch_shapes=[pltpu.VMEM((SUBLANES, LANES), jnp.float32)],
        ),
        compiler_params=pltpu.CompilerParams(
            dimension_semantics=("parallel", "arbitrary")),
    )(p2d, t2d)

    s = jnp.sum(partials)
    if reduction == "mean":
        return s / jnp.float32(total)
    return s


def _focal_loss_ref(pred, true, gamma=GAMMA, alpha=ALPHA):
    x = pred.astype(jnp.float32)
    y = true.astype(jnp.float32)
    bce = jnp.maximum(x, 0.0) - x * y + jnp.log1p(jnp.exp(-jnp.abs(x)))
    p = jax.nn.sigmoid(x)
    p_t = y * p + (1 - y) * (1 - p)
    af = y * alpha + (1 - y) * (1 - alpha)
    mf = (1.0 - p_t) ** gamma
    return jnp.mean(bce * af * mf)


if __name__ == "__main__":
    key = jax.random.PRNGKey(0)
    k1, k2 = jax.random.split(key)
    # small shapes consistent with a YOLO head output: (B, C, H, W)
    B, C, H, W = 2, 4, 16, 16
    pred = jax.random.normal(k1, (B, C, H, W), dtype=jnp.float32)
    # targets in [0, 1] (objectness/class targets)
    true = (jax.random.uniform(k2, (B, C, H, W)) > 0.7).astype(jnp.float32)

    out = focal_loss(pred, true, reduction="mean")
    out = jax.block_until_ready(out)

    ref = _focal_loss_ref(pred, true)
    assert jnp.allclose(out, ref, rtol=1e-4, atol=1e-5), (out, ref)
    print("KERNEL_OK")
</pallas_src>

<mosaic_0001>
module attributes {stable_mosaic.version = 11 : i64} {
  func.func @_focal_loss_kernel(%arg0: i32, %arg1: i32, %arg2: memref<16x128xf32, #tpu.memory_space<vmem>>, %arg3: memref<16x128xf32, #tpu.memory_space<vmem>>, %arg4: memref<8x128xf32, #tpu.memory_space<vmem>>, %arg5: memref<8x128xf32, #tpu.memory_space<vmem>>) attributes {dimension_semantics = [#tpu.dimension_semantics<parallel>, #tpu.dimension_semantics<arbitrary>], iteration_bounds = array<i64: 2, 1>, scalar_prefetch = 0 : i64, scratch_operands = 1 : i64, tpu.core_type = #tpu.core_type<tc>, window_params = [{transform_indices = @transform_0, window_bounds = array<i64: 16, 128>}, {transform_indices = @transform_1, window_bounds = array<i64: 16, 128>}, {transform_indices = @transform_2, window_bounds = array<i64: 8, 128>}]} {
    %c0_i32 = arith.constant 0 : i32
    %0 = arith.cmpi eq, %arg1, %c0_i32 : i32
    %1 = arith.extui %0 : i1 to i32
    %c0_i32_0 = arith.constant 0 : i32
    %2 = arith.cmpi ne, %1, %c0_i32_0 : i32
    scf.if %2 {
      %cst_22 = arith.constant 0.000000e+00 : f32
      %65 = vector.broadcast %cst_22 : f32 to vector<8x128xf32>
      %c0_23 = arith.constant 0 : index
      %c0_24 = arith.constant 0 : index
      %66 = vector.load %arg5[%c0_23, %c0_24] : memref<8x128xf32, #tpu.memory_space<vmem>>, vector<8x128xf32>
      tpu.vector_store %arg5[%c0_23, %c0_24], %65 {strides = array<i32>} : memref<8x128xf32, #tpu.memory_space<vmem>>, vector<8x128xf32>,
    } else {
    }
    %c0 = arith.constant 0 : index
    %c0_1 = arith.constant 0 : index
    %3 = vector.load %arg2[%c0, %c0_1] : memref<16x128xf32, #tpu.memory_space<vmem>>, vector<16x128xf32>
    %c0_2 = arith.constant 0 : index
    %c0_3 = arith.constant 0 : index
    %4 = vector.load %arg3[%c0_2, %c0_3] : memref<16x128xf32, #tpu.memory_space<vmem>>, vector<16x128xf32>
    %5 = math.absf %3 : vector<16x128xf32>
    %cst = arith.constant 0.000000e+00 : f32
    %6 = vector.broadcast %cst : f32 to vector<16x128xf32>
    %7 = arith.subf %6, %5 : vector<16x128xf32>
    %8 = math.exp %7 : vector<16x128xf32>
    %cst_4 = arith.constant 1.000000e+00 : f32
    %9 = vector.broadcast %cst_4 : f32 to vector<16x128xf32>
    %10 = arith.addf %9, %8 : vector<16x128xf32>
    %cst_5 = arith.constant 1.000000e+00 : f32
    %11 = vector.broadcast %cst_5 : f32 to vector<16x128xf32>
    %12 = arith.divf %11, %10 : vector<16x128xf32>
    %cst_6 = arith.constant 0.000000e+00 : f32
    %13 = vector.broadcast %cst_6 : f32 to vector<16x128xf32>
    %14 = arith.maximumf %3, %13 : vector<16x128xf32>
    %15 = arith.mulf %3, %4 : vector<16x128xf32>
    %16 = arith.subf %14, %15 : vector<16x128xf32>
    %17 = math.log1p %8 : vector<16x128xf32>
    %18 = arith.addf %16, %17 : vector<16x128xf32>
    %cst_7 = arith.constant 0.000000e+00 : f32
    %19 = vector.broadcast %cst_7 : f32 to vector<16x128xf32>
    %20 = arith.cmpf oge, %3, %19 : vector<16x128xf32>
    %21 = arith.mulf %8, %12 : vector<16x128xf32>
    %22 = arith.select %20, %12, %21 : vector<16x128xi1>, vector<16x128xf32>
    %23 = arith.mulf %4, %22 : vector<16x128xf32>
    %cst_8 = arith.constant 1.000000e+00 : f32
    %24 = vector.broadcast %cst_8 : f32 to vector<16x128xf32>
    %25 = arith.subf %24, %4 : vector<16x128xf32>
    %cst_9 = arith.constant 1.000000e+00 : f32
    %26 = vector.broadcast %cst_9 : f32 to vector<16x128xf32>
    %27 = arith.subf %26, %22 : vector<16x128xf32>
    %28 = arith.mulf %25, %27 : vector<16x128xf32>
    %29 = arith.addf %23, %28 : vector<16x128xf32>
    %cst_10 = arith.constant 2.500000e-01 : f32
    %30 = vector.broadcast %cst_10 : f32 to vector<16x128xf32>
    %31 = arith.mulf %4, %30 : vector<16x128xf32>
    %cst_11 = arith.constant 1.000000e+00 : f32
    %32 = vector.broadcast %cst_11 : f32 to vector<16x128xf32>
    %33 = arith.subf %32, %4 : vector<16x128xf32>
    %cst_12 = arith.constant 7.500000e-01 : f32
    %34 = vector.broadcast %cst_12 : f32 to vector<16x128xf32>
    %35 = arith.mulf %33, %34 : vector<16x128xf32>
    %36 = arith.addf %31, %35 : vector<16x128xf32>
    %cst_13 = arith.constant 1.000000e+00 : f32
    %37 = vector.broadcast %cst_13 : f32 to vector<16x128xf32>
    %38 = arith.subf %37, %29 : vector<16x128xf32>
    %39 = math.sqrt %38 : vector<16x128xf32>
    %40 = arith.mulf %38, %39 : vector<16x128xf32>
    %41 = arith.mulf %18, %36 : vector<16x128xf32>
    %42 = arith.mulf %41, %40 : vector<16x128xf32>
    %c1_i32 = arith.constant 1 : i32
    %43 = arith.muli %arg0, %c1_i32 : i32
    %44 = arith.addi %43, %arg1 : i32
    %45 = tpu.iota {dimensions = array<i32: 0>} : vector<16x128xi32>
    %46 = tpu.iota {dimensions = array<i32: 1>} : vector<16x128xi32>
    %c16_i32 = arith.constant 16 : i32
    %47 = arith.muli %44, %c16_i32 : i32
    %48 = vector.broadcast %47 : i32 to vector<16x128xi32>
    %49 = arith.addi %48, %45 : vector<16x128xi32>
    %c128_i32 = arith.constant 128 : i32
    %50 = vector.broadcast %c128_i32 : i32 to vector<16x128xi32>
    %51 = arith.muli %49, %50 : vector<16x128xi32>
    %52 = arith.addi %51, %46 : vector<16x128xi32>
    %c2048_i32 = arith.constant 2048 : i32
    %53 = vector.broadcast %c2048_i32 : i32 to vector<16x128xi32>
    %54 = arith.cmpi slt, %52, %53 : vector<16x128xi32>
    %cst_14 = arith.constant 0.000000e+00 : f32
    %55 = vector.broadcast %cst_14 : f32 to vector<16x128xf32>
    %56 = arith.select %54, %42, %55 : vector<16x128xi1>, vector<16x128xf32>
    %c0_15 = arith.constant 0 : index
    %c0_16 = arith.constant 0 : index
    %57 = vector.load %arg5[%c0_15, %c0_16] : memref<8x128xf32, #tpu.memory_space<vmem>>, vector<8x128xf32>
    %58 = vector.shape_cast %56 : vector<16x128xf32> to vector<2x8x128xf32>
    %cst_17 = arith.constant dense<0.000000e+00> : vector<8x128xf32>
    %59 = vector.multi_reduction <add>, %58, %cst_17 [0] : vector<2x8x128xf32> to vector<8x128xf32>
    %60 = arith.addf %57, %59 : vector<8x128xf32>
    %c0_18 = arith.constant 0 : index
    %c0_19 = arith.constant 0 : index
    %61 = vector.load %arg5[%c0_18, %c0_19] : memref<8x128xf32, #tpu.memory_space<vmem>>, vector<8x128xf32>
    tpu.vector_store %arg5[%c0_18, %c0_19], %60 {strides = array<i32>} : memref<8x128xf32, #tpu.memory_space<vmem>>, vector<8x128xf32>,
    %c0_i32_20 = arith.constant 0 : i32
    %62 = arith.cmpi eq, %arg1, %c0_i32_20 : i32
    %63 = arith.extui %62 : i1 to i32
    %c0_i32_21 = arith.constant 0 : i32
    %64 = arith.cmpi ne, %63, %c0_i32_21 : i32
    scf.if %64 {
      %c0_22 = arith.constant 0 : index
      %c0_23 = arith.constant 0 : index
      %65 = vector.load %arg5[%c0_22, %c0_23] : memref<8x128xf32, #tpu.memory_space<vmem>>, vector<8x128xf32>
      %c0_24 = arith.constant 0 : index
      %c0_25 = arith.constant 0 : index
      %66 = vector.load %arg4[%c0_24, %c0_25] : memref<8x128xf32, #tpu.memory_space<vmem>>, vector<8x128xf32>
      tpu.vector_store %arg4[%c0_24, %c0_25], %65 {strides = array<i32>} : memref<8x128xf32, #tpu.memory_space<vmem>>, vector<8x128xf32>,
    } else {
    }
    return
  }
  func.func @transform_0(%arg0: i32, %arg1: i32) -> (i32, i32) {
    %c1_i32 = arith.constant 1 : i32
    %0 = arith.muli %arg0, %c1_i32 : i32
    %1 = arith.addi %0, %arg1 : i32
    %c0_i32 = arith.constant 0 : i32
    %c0_i32_0 = arith.constant 0 : i32
    return %1, %c0_i32 : i32, i32
  }
  func.func @transform_1(%arg0: i32, %arg1: i32) -> (i32, i32) {
    %c1_i32 = arith.constant 1 : i32
    %0 = arith.muli %arg0, %c1_i32 : i32
    %1 = arith.addi %0, %arg1 : i32
    %c0_i32 = arith.constant 0 : i32
    %c0_i32_0 = arith.constant 0 : i32
    return %1, %c0_i32 : i32, i32
  }
  func.func @transform_2(%arg0: i32, %arg1: i32) -> (i32, i32) {
    %c0_i32 = arith.constant 0 : i32
    %c0_i32_0 = arith.constant 0 : i32
    return %arg0, %c0_i32 : i32, i32
  }
}

</mosaic_0001>

<bundles_post_ra>
// kernel: tpu_custom_call.1
= control target key start
LH: loop header
LB: loop body
LE: loop exit
PB: predicated region body
PF: predicated region fallthrough
CT: control target
= control target key end

     0   :  { %7 = vsyncpa [#allocation4], 0  ;;  %s979_s0 = inlined_call_operand.hbm [shape: f32[32,128], index: 0, kind: input, shape index: {}]   ;;  %s980_s1 = inlined_call_operand.hbm [shape: f32[32,128], index: 1, kind: input, shape index: {}]   ;;  %s981_s2 = inlined_call_operand.hbm [shape: f32[16,128], index: 2, kind: output, shape index: {}]  }
   0x1   :  { %9 = vsyncpa [#allocation4 + $0x1], 0 }
   0x2   :  { %10 = vsyncpa [#allocation7], 0 }
   0x3   :  { %12 = vsyncpa [#allocation7 + $0x1], 0 }
   0x4   :  { %13 = vsyncpa [#allocation5], 0 }
   0x5   :  { %15 = vsyncpa [#allocation5 + $0x1], 0  ;;  %s774_s9 = smov 0   ;;  %s776_s10 = smov 0  }
   0x6   :  { %s778_s11 = smov 0   ;;  %s780_s12 = smov 0  }
   0x7   :  { %s782_s13 = smov 0   ;;  %s784_s14 = smov 0  }
   0x8 LB: > { %s503_s15 = sadd.s32 4294967295, %s755_s14   ;;  %s504_s16 = sadd.s32 4294967294, %s755_s14   ;;  %s755_s14 = sphi %s784_s14, %s21_s14   ;;  %s751_s13 = sphi %s782_s13, %s995_s13   ;;  %s747_s12 = sphi %s780_s12, %s994_s12   ;;  %s743_s11 = sphi %s778_s11, %s993_s11   ;;  %s739_s10 = sphi %s776_s10, %s992_s10   ;;  %s735_s9 = sphi %s774_s9, %s991_s9  }
   0x9   : > { %s33_s17 = sadd.s32 1, %s751_s13  ;;  %s42_s18 = sadd.s32 1, %s743_s11 }
   0xa   : > { %p35_p0 = scmp.ge.s32.totalorder %s33_s17, 2  ;;  %p49_p1 = scmp.ne.s32.totalorder %s743_s11, %s739_s10 }
   0xb   : > { %p50_p2 = scmp.eq.s32.totalorder %s755_s14, 0  ;;  %p55_p3 = scmp.ne.s32.totalorder %s739_s10, %s735_s9 }
   0xc   : > { %s997_s17 = smov (%p35_p0, %s33_s17), 0  ;;  %p56_p5 = scmp.eq.s32.totalorder %s503_s15, 0 }
   0xd   : > { %p815_p4 = por %p50_p2, %p49_p1  ;;  %s39_s20 = ssub.s32 %s751_s13, %s997_s17 }
   0xe   : > { %p107_p6 = scmp.eq.s32.totalorder %s503_s15, 1  ;;  %p40_p7 = scmp.eq.s32.totalorder %s39_s20, 0 }
   0xf   : > { %p821_p8 = por %p56_p5, %p55_p3  ;;  %p113_p10 = scmp.eq.s32.totalorder %s504_s16, 1 }
  0x10   : > { %p825_p9 = por %p107_p6, %p49_p1  ;;  %p506_p12 = scmp.ge.s32.totalorder %s755_s14, 2 }
  0x11   : > { %s830_s23 = scalar_select %p40_p7, %s743_s11, %s42_s18  }
  0x12   : > { %p832_p11 = por %p113_p10, %p55_p3  ;;  %p541_p13 = scmp.lt.s32.totalorder %s755_s14, 2 }
  0x13   : > { %s839_s25 = sand.u32 1, %s743_s11   ;;  %s522_s27 = sshll.u32 %s751_s13, 4 }
  0x14   : > { %s507_s26 = sshll.u32 %s839_s25, 4  ;;  %s143_s30 = scalar_lea.hbm %s979_s0, %s522_s27 }
  0x15   : > { %s137_s3 = scalar_lea.vmem [#allocation3], %s507_s26  ;;  %s144_s5 = sshll.u32 %s143_s30, 4  ;;  %s145_s5 = int_to_ptr.hbm [resolvable:$true] %s144_s5 }
  0x16   : > { %s146_s4 = sshll.u32 %s137_s3, 4  ;;  %p848_p0 = pnand %p541_p13, %p815_p4  ;;  %s147_s4 = int_to_ptr.vmem [resolvable:$true] %s146_s4 }
  0x17   : > { %p513_p1 = scmp.ge.s32.totalorder %s755_s14, 1  ;;  %s134_s7 = scalar_lea.sflag [#allocation4], %s839_s25 }
  0x18   : > { %s757_s8 = smov 128   ;;  %s758_s15 = smov 8  }
  0x19   : > { %533 = dma.hbm_to_vmem [thread:$0]  (!%p848_p0), %s145_s5, 256, %s147_s4, %s134_s7, %s757_s8, %s757_s8, %s758_s15  }
  0x1a   : > { %p177_p2 = scmp.lt.s32.totalorder %s755_s14, 3  ;;  %s166_s20 = scalar_lea.hbm %s980_s1, %s522_s27 }
  0x1b   : > { %s167_s28 = sshll.u32 %s166_s20, 4  ;;  %s160_s19 = scalar_lea.vmem [#allocation6], %s507_s26  ;;  %s168_s28 = int_to_ptr.hbm [resolvable:$true] %s167_s28 }
  0x1c   : > { %p178_p3 = pnand %p513_p1, %p177_p2  ;;  %s169_s29 = sshll.u32 %s160_s19, 4  ;;  %s170_s29 = int_to_ptr.vmem [resolvable:$true] %s169_s29 }
  0x1d   : > { %s157_s30 = scalar_lea.sflag [#allocation7], %s839_s25  ;;  %s864_s3 = sand.u32 (!%p178_p3), 1, %s739_s10  }
  0x1e   : > { %536 = dma.hbm_to_vmem [thread:$0]  (!%p848_p0), %s168_s28, 256, %s170_s29, %s157_s30, %s757_s8, %s757_s8, %s758_s15  }
  0x1f   : > { %181 = sbr.rel (%p178_p3) target bundleno = 115 (0x73), region = 28  ;;  %s514_s4 = sshll.u32 (!%p178_p3), %s864_s3, 4 }
  0x20   : > { %s184_s5 = scalar_lea.sflag (!%p178_p3), [#allocation4], %s864_s3  ;;  %s187_s7 = scalar_lea.vmem (!%p178_p3), [#allocation3], %s514_s4 }
  0x24   : > { %722 = dma.done.wait (%p821_p8), %s184_s5, 256  }
  0x25   : > { %724 = vsyncadd (%p821_p8), %s184_s5, 4294967040  ;;  %s194_s25 = scalar_lea.sflag [#allocation7], %s864_s3  ;;  %s873_s26 = scalar_lea.vmem [#allocation6], %s514_s4 }
  0x26   : > { %726 = dma.done.wait (%p821_p8), %s194_s25, 256  }
  0x27   : > { %728 = vsyncadd (%p821_p8), %s194_s25, 4294967040  ;;  %v879_v0 = vld [vmem:[%s187_s7] sm:$0xff]  ;;  %v881_v1 = vld [vmem:[%s187_s7 + $0x8] sm:$0xff]  ;;  %v358_v50 = vlaneseq  ;;  %s517_s21 = sshll.u32 %s747_s12, 4  ;;  %s516_s27 = sshll.u32 %s864_s3, 3 }
  0x28   : > { %v237_v2 = vand.u32 2147483647, %v879_v0  ;;  %v238_v3 = vand.u32 2147483647, %v881_v1  ;;  %v235_v28 = vld [vmem:[%s873_s26] sm:$0xff]  ;;  %v236_v30 = vld [vmem:[%s873_s26 + $0x8] sm:$0xff] }
  0x29   : > { %vm303_vm8 = vcmp.ge.f32.partialorder %v879_v0, 0.0  ;;  %vm304_vm9 = vcmp.ge.f32.partialorder %v881_v1, 0.0  ;;  %v311_v36 = vsub.f32 1.0, %v235_v28  ;;  %v312_v38 = vsub.f32 1.0, %v236_v30  ;;  %s519_s6 = sshll.u32 %s747_s12, 3  ;;  %s223_s12 = scalar_lea.vmem [#allocation8], %s516_s27 }
  0x2a   : > { %v239_v4 = vsub.f32 0.0, %v237_v2  ;;  %v240_v5 = vsub.f32 0.0, %v238_v3  ;;  %v277_v53 = vmax.f32 %v879_v0, 0.0  ;;  %v279_v54 = vmul.f32 %v235_v28, %v879_v0  ;;  %s395_s16 = scalar_lea.hbm %s981_s2, %s519_s6  ;;  %s397_s18 = sshll.u32 %s223_s12, 4  ;;  %s398_s18 = int_to_ptr.vmem [resolvable:$true] %s397_s18 }
  0x2b   : > { %v359_v55 = vshrl.u32 %v358_v50, 7  ;;  %v278_v62 = vmax.f32 %v881_v1, 0.0  ;;  %v280_v63 = vmul.f32 %v236_v30, %v881_v1  ;;  %s399_s20 = sshll.u32 %s395_s16, 4  ;;  %s385_s28 = scalar_lea.sflag [#allocation5], %s864_s3  ;;  %s400_s20 = int_to_ptr.hbm [resolvable:$true] %s399_s20 }
  0x2c   : > { %v241_v6 = vmul.f32 1.442695, %v239_v4  ;;  %v243_v7 = vmul.f32 1.442695, %v240_v5  ;;  %v281_v4 = vsub.f32 %v277_v53, %v279_v54  ;;  %s683_s19 = sshra.s32 %s400_s20, 4  ;;  %s689_s5 = scalar_lea.hbm %s981_s2, 16  ;;  %s684_s19 = int_to_ptr.hbm [resolvable:$true] %s683_s19 }
  0x2d   : > { %v360_v0 = vadd.s32 8, %v359_v55  ;;  %s685_s29 = scalar_lea.hbm %s684_s19, 8  ;;  %p690_p7 = scmp.lt.s32.totalorder %s684_s19, %s981_s2 }
  0x2e   : > { %593 = vpow2.f32 %v241_v6  ;;  %v364_v6 = vstv %s517_s21  ;;  %p686_p4 = scmp.ne.s32.totalorder %s684_s19, %s685_s29  ;;  %p691_p8 = scmp.lt.s32.totalorder %s689_s5, %s685_s29 }
  0x2f   : > { %595 = vpow2.f32 %v243_v7 }
  0x30   : > { %p687_p5 = pnand %p686_p4, %p825_p9  ;;  %p692_p10 = por %p691_p8, %p690_p7 }
  0x32   : > { %p688_p6 = pneg %p687_p5 }
  0x34   : > { %v885_v8 = vpop.eup %593  ;;  %p693_p13 = pnand %p692_p10, %p688_p6 }
  0x35   : > { %v887_v9 = vpop.eup %595  ;;  %v245_v10 = vadd.f32 1.0, %v885_v8  ;;  %v286_v51 = vmul.f32 -0.5, %v885_v8  ;;  %v289_v59 = vand.u32 2147483647, %v885_v8 }
  0x36   : > { %v246_v11 = vadd.f32 1.0, %v887_v9  ;;  %v295_v52 = vmul.f32 -0.5, %v887_v9  ;;  %v298_v2 = vand.u32 2147483647, %v887_v9 }
  0x37   : > { %597 = vrcp.f32 %v245_v10  ;;  %vm252_vm0 = vweird.f32 %v245_v10  ;;  %v258_v15 = vand.u32 2147483648, %v245_v10  ;;  %v256_v18 = vand.u32 2147483647, %v245_v10 }
  0x38   : > { %599 = vrcp.f32 %v246_v11  ;;  %v273_v19 = vand.u32 2147483648, %v246_v11  ;;  %vm267_vm2 = vweird.f32 %v246_v11  ;;  %v271_v21 = vand.u32 2147483647, %v246_v11 }
  0x39   : > { %v259_v23 = vor.u32 1.1754944e-38, %v258_v15  ;;  %vm257_vm5 = vcmp.eq.f32.partialorder %v256_v18, 8.507059e+37  ;;  %601 = vlog2.f32 %v245_v10  ;;  %v287_v57 = vadd.f32 1.0, %v286_v51 }
  0x3a   : > { %v274_v26 = vor.u32 1.1754944e-38, %v273_v19  ;;  %vm272_vm7 = vcmp.eq.f32.partialorder %v271_v21, 8.507059e+37  ;;  %603 = vlog2.f32 %v246_v11  ;;  %v296_v60 = vadd.f32 1.0, %v295_v52 }
  0x3b   : > { %vm915_vm10 = vcmp.lt.f32.partialorder %v289_v59, 0.0004427343  ;;  %vm920_vm11 = vcmp.lt.f32.partialorder %v298_v2, 0.0004427343  ;;  %v365_v19 = vadd.s32 %v364_v6, %v359_v55 }
  0x3c   : > { %v297_v1 = vmul.f32 %v887_v9, %v296_v60 }
  0x3d   : > { %v598_v12 = vpop.eup %597 }
  0x3e   : > { %v600_v13 = vpop.eup %599  ;;  %v248_v14 = vmul.f32 %v598_v12, %v245_v10  ;;  %vm253_vm1 = vweird.f32 %v598_v12  ;;  %v288_v10 = vmul.f32 %v885_v8, %v287_v57 }
  0x3f   : > { %v263_v16 = vmul.f32 %v600_v13, %v246_v11  ;;  %vm268_vm3 = vweird.f32 %v600_v13  ;;  %vm254_vm4 = vmor %vm252_vm0, %vm253_vm1  ;;  %v602_v56 = vpop.eup %601  ;;  %v319_v11 = vmul.f32 0.25, %v235_v28 }
  0x40   : > { %v249_v17 = vsub.f32 1.0, %v248_v14  ;;  %vm269_vm6 = vmor %vm267_vm2, %vm268_vm3  ;;  %v604_v58 = vpop.eup %603  ;;  %v285_v7 = vmul.f32 0.6931472, %v602_v56 }
  0x41   : > { %v264_v20 = vsub.f32 1.0, %v263_v16  ;;  %v294_v14 = vmul.f32 0.6931472, %v604_v58 }
  0x42   : > { %v250_v22 = vmul.f32 %v598_v12, %v249_v17  ;;  %v321_v17 = vmul.f32 0.75, %v311_v36 }
  0x43   : > { %v265_v24 = vmul.f32 %v600_v13, %v264_v20  ;;  %v320_v20 = vmul.f32 0.25, %v236_v30 }
  0x44   : > { %v251_v25 = vadd.f32 %v598_v12, %v250_v22  ;;  %v366_v22 = vadd.s32 %v364_v6, %v360_v0 }
  0x45   : > { %v266_v27 = vadd.f32 %v600_v13, %v265_v24  ;;  %v291_v24 = vsel %vm915_vm10, %v288_v10, %v285_v7 }
  0x46   : > { %v255_v29 = vsel %vm254_vm4, %v598_v12, %v251_v25 }
  0x47   : > { %v260_v31 = vsel %vm257_vm5, %v259_v23, %v255_v29  ;;  %v270_v32 = vsel %vm269_vm6, %v600_v13, %v266_v27  ;;  %v282_v23 = vsub.f32 %v278_v62, %v280_v63  ;;  %v323_v27 = vadd.f32 %v321_v17, %v319_v11 }
  0x48   : > { %v275_v33 = vsel %vm272_vm7, %v274_v26, %v270_v32  ;;  %v305_v34 = vmul.f32 %v885_v8, %v260_v31  ;;  %v322_v8 = vmul.f32 0.75, %v312_v38  ;;  %v362_v29 = vand.u32 127, %v358_v50 }
  0x49   : > { %v306_v35 = vmul.f32 %v887_v9, %v275_v33  ;;  %v300_v9 = vsel %vm920_vm11, %v297_v1, %v294_v14  ;;  %v301_v32 = vadd.f32 %v291_v24, %v281_v4 }
  0x4a   : > { %v307_v37 = vsel %vm303_vm8, %v260_v31, %v305_v34  ;;  %v367_v31 = vmul.u32 128, %v365_v19  ;;  %v368_v34 = vmul.u32 128, %v366_v22 }
  0x4b   : > { %v308_v39 = vsel %vm304_vm9, %v275_v33, %v306_v35  ;;  %v309_v40 = vmul.f32 %v307_v37, %v235_v28  ;;  %v313_v41 = vsub.f32 1.0, %v307_v37  ;;  %v302_v35 = vadd.f32 %v300_v9, %v282_v23 }
  0x4c   : > { %v310_v42 = vmul.f32 %v308_v39, %v236_v30  ;;  %v314_v43 = vsub.f32 1.0, %v308_v39  ;;  %v324_v30 = vadd.f32 %v322_v8, %v320_v20 }
  0x4d   : > { %v315_v44 = vmul.f32 %v313_v41, %v311_v36  ;;  %v369_v41 = vadd.s32 %v367_v31, %v362_v29 }
  0x4e   : > { %v316_v45 = vmul.f32 %v314_v43, %v312_v38  ;;  %v353_v43 = vmul.f32 %v323_v27, %v301_v32 }
  0x4f   : > { %v317_v46 = vadd.f32 %v315_v44, %v309_v40  ;;  %v370_v44 = vadd.s32 %v368_v34, %v362_v29  ;;  %vm371_vm0 = vcmp.lt.s32.totalorder %v369_v41, 2048 }
  0x50   : > { %v318_v47 = vadd.f32 %v316_v45, %v310_v42 }
  0x51   : > { %v897_v48 = vsub.f32 1.0, %v317_v46  ;;  %vm372_vm1 = vcmp.lt.s32.totalorder %v370_v44, 2048 }
  0x52   : > { %v899_v49 = vsub.f32 1.0, %v318_v47  ;;  %v354_v47 = vmul.f32 %v324_v30, %v302_v35 }
  0x53   : > { %605 = vrsqrt.f32 %v897_v48  ;;  %vm334_vm12 = vcmp.eq.f32.partialorder %v897_v48, inf  ;;  %v337_v36 = vand.u32 2147483648, %v897_v48  ;;  %vm336_vm13 = vcmp.eq.f32.partialorder %v897_v48, 0.0 }
  0x54   : > { %607 = vrsqrt.f32 %v899_v49  ;;  %vm346_vm14 = vcmp.eq.f32.partialorder %v899_v49, inf  ;;  %v349_v39 = vand.u32 2147483648, %v899_v49  ;;  %vm348_vm15 = vcmp.eq.f32.partialorder %v899_v49, 0.0 }
  0x59   : > { %v606_v61 = vpop.eup %605 }
  0x5a   : > { %v608_v3 = vpop.eup %607  ;;  %v328_v5 = vmul.f32 %v606_v61, %v897_v48 }
  0x5b   : > { %v340_v12 = vmul.f32 %v608_v3, %v899_v49 }
  0x5c   : > { %v329_v15 = vmul.f32 %v606_v61, %v328_v5 }
  0x5d   : > { %v341_v18 = vmul.f32 %v608_v3, %v340_v12 }
  0x5e   : > { %v330_v21 = vmul.f32 0.5, %v329_v15 }
  0x5f   : > { %v342_v25 = vmul.f32 0.5, %v341_v18 }
  0x60   : > { %v331_v26 = vsub.f32 1.5, %v330_v21 }
  0x61   : > { %v343_v28 = vsub.f32 1.5, %v342_v25 }
  0x62   : > { %v332_v33 = vmul.f32 %v606_v61, %v331_v26 }
  0x63   : > { %v344_v37 = vmul.f32 %v608_v3, %v343_v28 }
  0x64   : > { %v333_v38 = vmul.f32 %v332_v33, %v897_v48 }
  0x65   : > { %v345_v40 = vmul.f32 %v344_v37, %v899_v49 }
  0x66   : > { %v335_v42 = vsel %vm334_vm12, %v897_v48, %v333_v38 }
  0x67   : > { %v338_v45 = vsel %vm336_vm13, %v337_v36, %v335_v42  ;;  %v347_v46 = vsel %vm346_vm14, %v899_v49, %v345_v40 }
  0x68   : > { %v350_v50 = vsel %vm348_vm15, %v349_v39, %v347_v46  ;;  %v351_v51 = vmul.f32 %v338_v45, %v897_v48 }
  0x69   : > { %v352_v52 = vmul.f32 %v350_v50, %v899_v49 }
  0x6a   : > { %v355_v53 = vmul.f32 %v353_v43, %v351_v51 }
  0x6b   : > { %v356_v54 = vmul.f32 %v354_v47, %v352_v52 }
  0x6c   : > { %v373_v55 = vsel %vm371_vm0, %v355_v53, 0.0 }
  0x6d   : > { %v374_v56 = vsel %vm372_vm1, %v356_v54, 0.0 }
  0x6e   : > { %v376_v57 = vadd.f32 %v374_v56, %v373_v55 }
  0x70   : > { %383 = vst [vmem:[%s223_s12] sm:$0xff] %v376_v57 }
  0x71   : > { %696 = shalt.err (!%p693_p13)
}
  0x72   : > { %528 = dma.vmem_to_hbm [thread:$0]  (%p825_p9), %s398_s18, 128, %s400_s20, %s385_s28  }
  0x73 PF: > { %s411_s3 = sand.u32 1, %s735_s9   ;;  %p538_p0 = pnand %p506_p12, %p832_p11 }
  0x74   : > { %s412_s26 = scalar_lea.sflag [#allocation5], %s411_s3 }
  0x75   : > { %p539_p1 = pneg %p538_p0 }
  0x77   : > { %730 = dma.done.wait (%p539_p1), %s412_s26, 128  }
  0x78   : > { %732 = vsyncadd (%p539_p1), %s412_s26, 4294967168  ;;  %s21_s14 = sadd.s32 1, %s755_s14   ;;  %s991_s9 = smov %s739_s10 }
  0x79   : > { %p18_p2 = scmp.ge.s32.totalorder %s21_s14, 4   ;;  %s992_s10 = smov %s743_s11 }
  0x7a   : > { %s993_s11 = smov %s830_s23  ;;  %s994_s12 = smov %s751_s13 }
  0x7b   : > { %s995_s13 = smov %s997_s17  ;;  %20 = sbr.rel (!%p18_p2) target bundleno = 8 (0x8), region = 94 }
  0x80   :  { %418 = vsyncpa [#allocation4], 1 }
  0x81   :  { %420 = vsyncpa [#allocation4 + $0x1], 1 }
  0x82   :  { %421 = vsyncpa [#allocation7], 1 }
  0x83   :  { %423 = vsyncpa [#allocation7 + $0x1], 1 }
  0x84   :  { %424 = vsyncpa [#allocation5], 1 }
  0x85   :  { %426 = vsyncpa [#allocation5 + $0x1], 1 }

</bundles_post_ra>
